<compile_context>
chip_gen: v7x
topology: tpu7x:2x2x1
jax: 0.10.0
libtpu: 0.0.40
codegen_flags: <defaults>
</compile_context>

<pallas_src>
import functools

import jax
import jax.numpy as jnp
from jax.experimental import pallas as pl
from jax.experimental.pallas import tpu as pltpu

NUM_CLASSES = 15          # len(Categories) in the PyTorch module
_LANE = 128
_SUBLANE = 8
_MAX_TK = 8192            # max K elements per grid step (x tile <= bm*tk*4 bytes)
_MAX_BM = 256             # max batch rows per grid step
_VMEM_LIMIT = 48 * 1024 * 1024   # safe on v5e/v6e (128 MiB phys) and v7x (64 MiB phys)


def _round_up(x, m):
    return (x + m - 1) // m * m


def _choose_tk(D):
    """K tile: whole (lane-padded) D when it fits, else large 8K-wide tiles."""
    return min(_round_up(D, _LANE), _MAX_TK)


def _choose_bm(B):
    """Batch tile: >=2 blocks for B >= 16 so both v7x TensorCores get work."""
    if B <= _SUBLANE:
        return B                       # block equals full dim -> always legal
    return min(_round_up(-(-B // 2), _SUBLANE), _MAX_BM)


def _svm_kernel(x_ref, w_ref, b_ref, o_ref, *, d_valid, tk, mask_tail):
    # x_ref: (bm, tk) f32/bf16 | w_ref: (tk, 128) bf16 | b_ref: (1, 128) f32
    # o_ref: (bm, 128) f32, VMEM-resident across the whole K reduction.
    k = pl.program_id(1)

    @pl.when(k == 0)
    def _init():
        # Fold the bias into the accumulator init (lane-padded -> dense store).
        o_ref[...] = jnp.broadcast_to(b_ref[...], o_ref.shape)

    x = x_ref[...]
    if mask_tail:
        # Only compiled in when D % tk != 0: zero the K-tail columns of the
        # boundary block (their weight rows are zero-padded too; the mask
        # guards against undefined OOB x buffer contents).
        col = jax.lax.broadcasted_iota(jnp.int32, x.shape, 1) + k * tk
        x = jnp.where(col < d_valid, x, jnp.zeros_like(x))

    o_ref[...] += jnp.dot(
        x.astype(jnp.bfloat16),            # no-op if x already bf16
        w_ref[...],
        preferred_element_type=jnp.float32,  # f32 accumulate on the MXU
    )


def prepare_svm_params(weight, bias):
    """One-time param prep (init-time; never in the forward hot path).

    weight: (num_classes, D) float32 (PyTorch nn.Linear layout)
    bias:   (num_classes,)   float32
    Returns (w_pad, b_pad):
      w_pad: (round_up(D, tk), 128) bfloat16, transposed + zero-padded
      b_pad: (1, 128)               float32, zero-padded
    """
    weight = jnp.asarray(weight, jnp.float32)
    bias = jnp.asarray(bias, jnp.float32)
    n, d = weight.shape
    tk = _choose_tk(d)
    kd = _round_up(d, tk)              # K padded to a whole number of K tiles
    n_pad = _round_up(n, _LANE)        # class dim lane-padded -> dense stores
    w_pad = jnp.zeros((kd, n_pad), jnp.bfloat16).at[:d, :n].set(
        weight.T.astype(jnp.bfloat16))
    b_pad = jnp.zeros((1, n_pad), jnp.float32).at[0, :n].set(bias)
    return w_pad, b_pad


@functools.partial(jax.jit, static_argnames=("num_classes",))
def svm_forward(x_nchw, w_pad, b_pad, num_classes=NUM_CLASSES):
    """SVM forward: x.view(B, -1) @ W^T + b on the MXU.

    x_nchw: (B, C, H, W) float32 (or bfloat16)
    w_pad:  (KD, 128)    bfloat16  (from prepare_svm_params)
    b_pad:  (1, 128)     float32
    returns (B, num_classes) float32
    """
    B = x_nchw.shape[0]
    x = x_nchw.reshape(B, -1)          # same flatten order as torch .view(B, -1)
    D = x.shape[1]
    KD, NP = w_pad.shape

    tk = _choose_tk(D)
    assert KD % tk == 0 and NP % _LANE == 0, "params not from prepare_svm_params"
    nk = KD // tk                      # == 1 for D <= 8192 (no K tiling at all)
    mask_tail = (D % tk) != 0          # boundary x block reads past D

    bm = _choose_bm(B)
    nb = pl.cdiv(B, bm)
    # NOTE: when bm does not divide B the last batch block relies on Pallas
    # masking OOB output rows; dot rows are independent, so this is safe.

    kernel = functools.partial(_svm_kernel, d_valid=D, tk=tk, mask_tail=mask_tail)

    cost = pl.CostEstimate(
        flops=2 * B * KD * NP,
        transcendentals=0,
        bytes_accessed=(B * D * x.dtype.itemsize      # x streamed once
                        + nb * KD * NP * 2            # weight re-read per batch block
                        + nb * NP * 4                 # bias
                        + B * NP * 4),                # output
    )

    out_pad = pl.pallas_call(
        kernel,
        out_shape=jax.ShapeDtypeStruct((B, NP), jnp.float32),
        grid=(nb, nk),                 # reduction axis last, batch axis parallel
        in_specs=[
            pl.BlockSpec((bm, tk), lambda i, k: (i, k)),   # x tile
            pl.BlockSpec((tk, NP), lambda i, k: (k, 0)),   # weight tile (lane-padded)
            pl.BlockSpec((1, NP), lambda i, k: (0, 0)),    # bias (tiny, resident)
        ],
        out_specs=pl.BlockSpec((bm, NP), lambda i, k: (i, 0)),  # resident over K
        compiler_params=pltpu.CompilerParams(
            dimension_semantics=("parallel", "arbitrary"),
            vmem_limit_bytes=_VMEM_LIMIT,
        ),
        cost_estimate=cost,
    )(x, w_pad, b_pad)

    # TODO(synk): if callers want the padded logits (e.g. fused loss), skip this slice.
    return out_pad[:, :num_classes]


if __name__ == "__main__":
    # Small shapes consistent with the module: NCHW image input, flattened.
    B, C, H, W = 2, 3, 16, 16          # input_dim = C*H*W = 768
    D = C * H * W

    key = jax.random.PRNGKey(0)
    kx, kw, kb, kx2 = jax.random.split(key, 4)

    # Deterministic init mimicking nn.Linear default: U(-1/sqrt(D), 1/sqrt(D)).
    bound = 1.0 / (float(D) ** 0.5)
    weight = jax.random.uniform(kw, (NUM_CLASSES, D), jnp.float32, -bound, bound)
    bias = jax.random.uniform(kb, (NUM_CLASSES,), jnp.float32, -bound, bound)
    x = jax.random.normal(kx, (B, C, H, W), jnp.float32)

    # Init-time parameter prep (transpose, bf16 cast, lane/K zero-padding).
    w_pad, b_pad = prepare_svm_params(weight, bias)
    w_pad, b_pad = jax.block_until_ready((w_pad, b_pad))

    out = svm_forward(x, w_pad, b_pad)
    out = jax.block_until_ready(out)

    ref = x.reshape(B, -1) @ weight.T + bias
    assert out.shape == (B, NUM_CLASSES)
    assert jnp.allclose(out, ref, atol=5e-2, rtol=5e-2), float(
        jnp.max(jnp.abs(out - ref)))

    # Second check: B=10 exercises 2 batch blocks (v7x megacore path) with a
    # partial final block.
    x2 = jax.random.normal(kx2, (10, C, H, W), jnp.float32)
    out2 = jax.block_until_ready(svm_forward(x2, w_pad, b_pad))
    ref2 = x2.reshape(10, -1) @ weight.T + bias
    assert out2.shape == (10, NUM_CLASSES)
    assert jnp.allclose(out2, ref2, atol=5e-2, rtol=5e-2), float(
        jnp.max(jnp.abs(out2 - ref2)))

    print("KERNEL_OK")
</pallas_src>

<mosaic_0001>
module attributes {stable_mosaic.version = 11 : i64} {
  func.func @_svm_kernel(%arg0: i32, %arg1: i32, %arg2: memref<2x768xf32, #tpu.memory_space<vmem>>, %arg3: memref<768x128xbf16, #tpu.memory_space<vmem>>, %arg4: memref<1x128xf32, #tpu.memory_space<vmem>>, %arg5: memref<2x128xf32, #tpu.memory_space<vmem>>) attributes {dimension_semantics = [#tpu.dimension_semantics<parallel>, #tpu.dimension_semantics<arbitrary>], iteration_bounds = array<i64: 1, 1>, scalar_prefetch = 0 : i64, scratch_operands = 0 : i64, tpu.core_type = #tpu.core_type<tc>, window_params = [{transform_indices = @transform_0, window_bounds = array<i64: 2, 768>}, {transform_indices = @transform_1, window_bounds = array<i64: 768, 128>}, {pipeline_mode = #tpu.pipeline_mode<synchronous>, transform_indices = @transform_2, window_bounds = array<i64: 1, 128>}, {transform_indices = @transform_3, window_bounds = array<i64: 2, 128>}]} {
    %c0_i32 = arith.constant 0 : i32
    %0 = arith.cmpi eq, %arg1, %c0_i32 : i32
    %1 = arith.extui %0 : i1 to i32
    %c0_i32_0 = arith.constant 0 : i32
    %2 = arith.cmpi ne, %1, %c0_i32_0 : i32
    scf.if %2 {
      %c0_8 = arith.constant 0 : index
      %c0_9 = arith.constant 0 : index
      %10 = vector.load %arg4[%c0_8, %c0_9] : memref<1x128xf32, #tpu.memory_space<vmem>>, vector<1x128xf32>
      %11 = vector.shape_cast %10 : vector<1x128xf32> to vector<1x128xf32>
      %12 = vector.broadcast %11 : vector<1x128xf32> to vector<2x128xf32>
      %c0_10 = arith.constant 0 : index
      %c0_11 = arith.constant 0 : index
      %13 = vector.load %arg5[%c0_10, %c0_11] : memref<2x128xf32, #tpu.memory_space<vmem>>, vector<2x128xf32>
      tpu.vector_store %arg5[%c0_10, %c0_11], %12 {strides = array<i32>} : memref<2x128xf32, #tpu.memory_space<vmem>>, vector<2x128xf32>,
    } else {
    }
    %c0 = arith.constant 0 : index
    %c0_1 = arith.constant 0 : index
    %3 = vector.load %arg2[%c0, %c0_1] : memref<2x768xf32, #tpu.memory_space<vmem>>, vector<2x768xf32>
    %c0_2 = arith.constant 0 : index
    %c0_3 = arith.constant 0 : index
    %4 = vector.load %arg5[%c0_2, %c0_3] : memref<2x128xf32, #tpu.memory_space<vmem>>, vector<2x128xf32>
    %5 = arith.truncf %3 : vector<2x768xf32> to vector<2x768xbf16>
    %c0_4 = arith.constant 0 : index
    %c0_5 = arith.constant 0 : index
    %6 = vector.load %arg3[%c0_4, %c0_5] : memref<768x128xbf16, #tpu.memory_space<vmem>>, vector<768x128xbf16>
    %cst = arith.constant dense<0.000000e+00> : vector<2x128xf32>
    %7 = tpu.matmul %5, %6, %cst {dimension_numbers = #tpu.dot_dimension_numbers<[1], [0], [0], [1], [0, 0, 1, 1], [], []>} : vector<2x768xbf16>, vector<768x128xbf16>, vector<2x128xf32> -> vector<2x128xf32>
    %8 = arith.addf %4, %7 : vector<2x128xf32>
    %c0_6 = arith.constant 0 : index
    %c0_7 = arith.constant 0 : index
    %9 = vector.load %arg5[%c0_6, %c0_7] : memref<2x128xf32, #tpu.memory_space<vmem>>, vector<2x128xf32>
    tpu.vector_store %arg5[%c0_6, %c0_7], %8 {strides = array<i32>} : memref<2x128xf32, #tpu.memory_space<vmem>>, vector<2x128xf32>,
    return
  }
  func.func @transform_0(%arg0: i32, %arg1: i32) -> (i32, i32) {
    %c0_i32 = arith.constant 0 : i32
    return %arg0, %arg1 : i32, i32
  }
  func.func @transform_1(%arg0: i32, %arg1: i32) -> (i32, i32) {
    %c0_i32 = arith.constant 0 : i32
    %c0_i32_0 = arith.constant 0 : i32
    return %arg1, %c0_i32 : i32, i32
  }
  func.func @transform_2(%arg0: i32, %arg1: i32) -> (i32, i32) {
    %c0_i32 = arith.constant 0 : i32
    %c0_i32_0 = arith.constant 0 : i32
    %c0_i32_1 = arith.constant 0 : i32
    return %c0_i32, %c0_i32_0 : i32, i32
  }
  func.func @transform_3(%arg0: i32, %arg1: i32) -> (i32, i32) {
    %c0_i32 = arith.constant 0 : i32
    %c0_i32_0 = arith.constant 0 : i32
    return %arg0, %c0_i32 : i32, i32
  }
}

</mosaic_0001>

<bundles_post_ra>
// kernel: svm_forward.1
= control target key start
LH: loop header
LB: loop body
LE: loop exit
PB: predicated region body
PF: predicated region fallthrough
CT: control target
= control target key end

     0   :  { %8 = vsyncpa [#allocation3], 0  ;;  %s881_s0 = inlined_call_operand.vmem [shape: f32[2,768], index: 0, kind: input, shape index: {}]   ;;  %s882_s1 = inlined_call_operand.hbm [shape: bf16[768,128], index: 1, kind: input, shape index: {}]   ;;  %s883_s2 = inlined_call_operand.vmem [shape: f32[1,128], index: 2, kind: input, shape index: {}]   ;;  %s884_s3 = inlined_call_operand.hbm [shape: f32[2,128], index: 3, kind: output, shape index: {}]  }
   0x1   :  { %9 = vsyncpa [#allocation4], 0  ;;  %s823_s12 = smov [#allocation2]   ;;  %s775_s16 = scalar_lea.hbm %s882_s1, 6144 }
   0x2   :  { %s17_s13 = sshll.u32 %s823_s12, 4  ;;  %p776_p0 = scmp.ne.s32.totalorder %s882_s1, %s775_s16  ;;  %s18_s13 = int_to_ptr.vmem [resolvable:$true] %s17_s13 }
   0x3   :  { %p779_p1 = scmp.lt.u32.totalorder %s775_s16, %s882_s1 }
   0x5   :  { %p781_p2 = pnand %p779_p1, %p776_p0 }
   0x7   :  { %784 = shalt.err (!%p781_p2)
}
   0x8   :  { %s785_s21 = scalar_lea.vmem %s18_s13, 6144  ;;  %p790_p4 = scmp.lt.s32.totalorder %s18_s13, %s18_s13 }
   0x9   :  { %p786_p3 = scmp.ne.s32.totalorder %s18_s13, %s785_s21  ;;  %p791_p5 = scmp.lt.s32.totalorder %s785_s21, %s785_s21 }
   0xb   :  { %p792_p6 = por %p791_p5, %p790_p4 }
   0xd   :  { %p793_p7 = pnand %p792_p6, %p786_p3 }
   0xf   :  { %796 = shalt.err (!%p793_p7)
}
  0x10   :  { %s824_s22 = smov 64   ;;  %s825_s23 = smov 4  }
  0x11   :  { %23 = dma.hbm_to_vmem [thread:$0]  %s882_s1, 6144, %s18_s13, [#allocation3], %s824_s22, %s824_s22, %s825_s23  }
  0x12   :  { %819 = dma.done.wait [#allocation3], 6144  }
  0x13   :  { %820 = vsyncadd [#allocation3], 4294961152  ;;  %v726_v0 = vld [vmem:[#allocation2 + $0x40] sm:$0xff]   ;;  %v730_v4 = vld [vmem:[#allocation2 + $0x48] sm:$0xff]   ;;  %v826_v22 = vmov 1983009808   ;;  %v51_v24 = vlaneseq }
  0x14   :  { %v727_v1 = vld [vmem:[#allocation2 + $0xc0] sm:$0xff]   ;;  %655 = vmatprep.subr.bf16.mxu0 %v726_v0  ;;  %v731_v5 = vld [vmem:[#allocation2 + $0xc8] sm:$0xff]   ;;  %v734_v8 = vld [vmem:[#allocation2 + $0x50] sm:$0xff]   ;;  %v49_v23 = vunpack.c.l.s4 %v826_v22  ;;  %s827_s30 = smov [#allocation5]  }
  0x15   :  { %v728_v2 = vld [vmem:[#allocation2] sm:$0xff]   ;;  %677 = vmatprep.subr.bf16.mxu1 %v727_v1  ;;  %v732_v6 = vld [vmem:[#allocation2 + $0x8] sm:$0xff]   ;;  %v735_v9 = vld [vmem:[#allocation2 + $0xd0] sm:$0xff]   ;;  %v52_v30 = vshrl.u32 %v51_v24, 7 }
  0x16   :  { %v729_v3 = vld [vmem:[#allocation2 + $0x80] sm:$0xff]   ;;  %656 = vmatpush3.bf16.msra.mxu0 %v728_v2  ;;  %v733_v7 = vld [vmem:[#allocation2 + $0x88] sm:$0xff]   ;;  %v736_v10 = vld [vmem:[#allocation2 + $0x10] sm:$0xff]   ;;  %v50_v29 = vunpack.c.0.s8 %v49_v23 }
  0x17   :  { %678 = vmatpush3.bf16.msra.mxu1 %v729_v3  ;;  %657 = vmatprep.subr.bf16.mxu0 %v730_v4  ;;  %v737_v11 = vld [vmem:[#allocation2 + $0x90] sm:$0xff]   ;;  %v738_v12 = vld [vmem:[#allocation2 + $0x58] sm:$0xff]   ;;  %v742_v16 = vld [vmem:[#allocation2 + $0x60] sm:$0xff]  }
  0x18   :  { %679 = vmatprep.subr.bf16.mxu1 %v731_v5  ;;  %v739_v13 = vld [vmem:[#allocation2 + $0xd8] sm:$0xff]   ;;  %v743_v17 = vld [vmem:[#allocation2 + $0xe0] sm:$0xff]   ;;  %v746_v20 = vld [vmem:[#allocation2 + $0x68] sm:$0xff]   ;;  %v53_v35 = vsub.s32 %v50_v29, %v52_v30 }
  0x19   :  { %v740_v14 = vld [vmem:[#allocation2 + $0x18] sm:$0xff]   ;;  %v744_v18 = vld [vmem:[#allocation2 + $0x20] sm:$0xff]   ;;  %v747_v21 = vld [vmem:[#allocation2 + $0xe8] sm:$0xff]  }
  0x1a   :  { %658 = vmatpush3.bf16.msra.mxu0 %v732_v6  ;;  %v741_v15 = vld [vmem:[#allocation2 + $0x98] sm:$0xff]   ;;  %v745_v19 = vld [vmem:[#allocation2 + $0xa0] sm:$0xff]   ;;  %v748_v25 = vld [vmem:[#allocation2 + $0x28] sm:$0xff]  }
  0x1b   :  { %680 = vmatpush3.bf16.msra.mxu1 %v733_v7  ;;  %659 = vmatprep.subr.bf16.mxu0 %v734_v8  ;;  %v749_v26 = vld [vmem:[#allocation2 + $0xa8] sm:$0xff]   ;;  %v750_v27 = vld [vmem:[#allocation2 + $0x70] sm:$0xff]   ;;  %v754_v33 = vld [vmem:[#allocation2 + $0x78] sm:$0xff]  }
  0x1c   :  { %681 = vmatprep.subr.bf16.mxu1 %v735_v9  ;;  %v751_v28 = vld [vmem:[#allocation2 + $0xf0] sm:$0xff]   ;;  %v755_v34 = vld [vmem:[#allocation2 + $0xf8] sm:$0xff]   ;;  %v42_v38 = vld [vmem:[%s881_s0] sm:$0xff] }
  0x1d   :  { %v752_v31 = vld [vmem:[#allocation2 + $0x30] sm:$0xff]   ;;  %v756_v36 = vld [vmem:[#allocation2 + $0x38] sm:$0xff]   ;;  %v54_v39 = vrot.slane %v42_v38, %v53_v35  ;;  %v47_v40 = vcombine.high %v42_v38, %v42_v38  ;;  %v759_v41 = vld [vmem:[#allocation2 + $0x140] sm:$0xff]  }
  0x1e   :  { %660 = vmatpush3.bf16.msra.mxu0 %v736_v10  ;;  %v753_v32 = vld [vmem:[#allocation2 + $0xb0] sm:$0xff]   ;;  %v757_v37 = vld [vmem:[#allocation2 + $0xb8] sm:$0xff]   ;;  %v760_v47 = vld [vmem:[#allocation2 + $0x100] sm:$0xff]  }
  0x1f   :  { %682 = vmatpush3.bf16.msra.mxu1 %v737_v11  ;;  %661 = vmatprep.subr.bf16.mxu0 %v738_v12  ;;  %v62_v42 = vcombine.high %v54_v39, %v54_v39  ;;  %v61_v43 = vrot.slane %v47_v40, %v53_v35  ;;  %v78_v44 = vpack.c.bf16 %v54_v39, %v54_v39  ;;  %v761_v49 = vld [vmem:[#allocation2 + $0x148] sm:$0xff]   ;;  %v763_v52 = vld [vmem:[#allocation2 + $0x150] sm:$0xff]   ;;  %v765_v54 = vld [vmem:[#allocation2 + $0x158] sm:$0xff]  }
  0x20   :  { %683 = vmatprep.subr.bf16.mxu1 %v739_v13  ;;  %v762_v51 = vld [vmem:[#allocation2 + $0x108] sm:$0xff]   ;;  %v764_v53 = vld [vmem:[#allocation2 + $0x110] sm:$0xff]   ;;  %v766_v56 = vld [vmem:[#allocation2 + $0x118] sm:$0xff]  }
  0x21   :  { %v79_v45 = vpack.c.bf16 %v62_v42, %v62_v42  ;;  %v63_v46 = vcombine.high %v61_v43, %v61_v43  ;;  %v80_v48 = vpack.c.bf16 %v61_v43, %v61_v43  ;;  %v606_v55 = vld.sshfl [vmem:[%s881_s0 + $0x8] sm:$0x33 pattern:$0x76325410]  ;;  %v767_v58 = vld [vmem:[#allocation2 + $0x160] sm:$0xff]   ;;  %v771_v63 = vld [vmem:[#allocation2 + $0x170] sm:$0xff]  }
  0x22   :  { %662 = vmatpush3.bf16.msra.mxu0 %v740_v14  ;;  %v71_v57 = vcombine.high %v606_v55, %v606_v55  ;;  %v768_v60 = vld [vmem:[#allocation2 + $0x120] sm:$0xff]   ;;  %v769_v61 = vld [vmem:[#allocation2 + $0x168] sm:$0xff]   ;;  %v772_v0 = vld [vmem:[#allocation2 + $0x130] sm:$0xff]   ;;  %v82_v3 = vpack.c.bf16 %v606_v55, %v606_v55 }
  0x23   :  { %684 = vmatpush3.bf16.msra.mxu1 %v741_v15  ;;  %663 = vmatprep.subr.bf16.mxu0 %v742_v16  ;;  %v81_v50 = vpack.c.bf16 %v63_v46, %v63_v46  ;;  %v770_v62 = vld [vmem:[#allocation2 + $0x128] sm:$0xff]   ;;  %v773_v1 = vld [vmem:[#allocation2 + $0x178] sm:$0xff]   ;;  %v605_v4 = vld [vmem:[%s883_s2] ss:$0 sm:$0xff]  ;;  %s596_s2 = sshll.u32 %s827_s30, 4  ;;  %s597_s2 = int_to_ptr.vmem [resolvable:$true] %s596_s2 }
  0x24   :  { %685 = vmatprep.subr.bf16.mxu1 %v743_v17  ;;  %500 = vmatprep.mubr.bf16.mxu0 %v79_v45  ;;  %v83_v59 = vpack.c.bf16 %v71_v57, %v71_v57  ;;  %v774_v2 = vld [vmem:[#allocation2 + $0x138] sm:$0xff]   ;;  %41 = vst [vmem:[#allocation5] sm:$0x3] %v605_v4  ;;  %s797_s4 = scalar_lea.vmem %s597_s2, 32  ;;  %p802_p9 = scmp.lt.s32.totalorder %s597_s2, %s597_s2 }
  0x25   :  { %540 = vmatprep.mubr.bf16.mxu1 %v81_v50  ;;  %p798_p8 = scmp.ne.s32.totalorder %s597_s2, %s797_s4  ;;  %p803_p10 = scmp.lt.s32.totalorder %s797_s4, %s797_s4 }
  0x26   :  { %664 = vmatpush3.bf16.msra.mxu0 %v744_v18 }
  0x27   :  { %686 = vmatpush3.bf16.msra.mxu1 %v745_v19  ;;  %665 = vmatprep.subr.bf16.mxu0 %v746_v20  ;;  %p804_p11 = por %p803_p10, %p802_p9 }
  0x28   :  { %687 = vmatprep.subr.bf16.mxu1 %v747_v21 }
  0x29   :  { %p805_p12 = pnand %p804_p11, %p798_p8 }
  0x2a   :  { %666 = vmatpush3.bf16.msra.mxu0 %v748_v25 }
  0x2b   :  { %688 = vmatpush3.bf16.msra.mxu1 %v749_v26  ;;  %667 = vmatprep.subr.bf16.mxu0 %v750_v27  ;;  %v44_v20 = vld [vmem:[#allocation5] sm:$0x3] }
  0x2c   :  { %689 = vmatprep.subr.bf16.mxu1 %v751_v28 }
  0x2e   :  { %668 = vmatpush3.bf16.msra.mxu0 %v752_v31 }
  0x2f   :  { %690 = vmatpush3.bf16.msra.mxu1 %v753_v32  ;;  %669 = vmatprep.subr.bf16.mxu0 %v754_v33 }
  0x30   :  { %691 = vmatprep.subr.bf16.mxu1 %v755_v34 }
  0x32   :  { %670 = vmatpush3.bf16.msra.mxu0 %v756_v36 }
  0x33   :  { %692 = vmatpush3.bf16.msra.mxu1 %v757_v37  ;;  %699 = vmatprep.subr.bf16.mxu0 %v759_v41 }
  0x35   :  { %501 = vmatmul.mubr.bf16.vlgmr.msra.gmra.mrb[0].mxu0 %v78_v44 }
  0x36   :  { %700 = vmatpush3.bf16.msra.mxu0 %v760_v47  ;;  %541 = vmatmul.mubr.bf16.vlgmr.msra.gmra.mrb[0].mxu1 %v80_v48 }
  0x37   :  { %701 = vmatprep.subr.bf16.mxu0 %v761_v49  ;;  %580 = vmatprep.mubr.bf16.mxu0 %v83_v59 }
  0x3a   :  { %702 = vmatpush3.bf16.msra.mxu0 %v762_v51 }
  0x3b   :  { %703 = vmatprep.subr.bf16.mxu0 %v763_v52 }
  0x3e   :  { %704 = vmatpush3.bf16.msra.mxu0 %v764_v53 }
  0x3f   :  { %705 = vmatprep.subr.bf16.mxu0 %v765_v54 }
  0x42   :  { %706 = vmatpush3.bf16.msra.mxu0 %v766_v56 }
  0x43   :  { %707 = vmatprep.subr.bf16.mxu0 %v767_v58 }
  0x46   :  { %708 = vmatpush3.bf16.msra.mxu0 %v768_v60 }
  0x47   :  { %709 = vmatprep.subr.bf16.mxu0 %v769_v61 }
  0x4a   :  { %710 = vmatpush3.bf16.msra.mxu0 %v770_v62 }
  0x4b   :  { %711 = vmatprep.subr.bf16.mxu0 %v771_v63 }
  0x4e   :  { %712 = vmatpush3.bf16.msra.mxu0 %v772_v0 }
  0x4f   :  { %713 = vmatprep.subr.bf16.mxu0 %v773_v1 }
  0x52   :  { %714 = vmatpush3.bf16.msra.mxu0 %v774_v2 }
  0x55   :  { %581 = vmatmul.mubr.bf16.vlgmr.msra.gmra.mrb[4].mxu0 %v82_v3 }
 0x108   :  { %v671_v5 = vpop.f32.mrb[0].mxu0 }
 0x109   :  { %v672_v6 = vpop.f32.mrb[1].mxu0  ;;  %v693_v7 = vpop.f32.mrb[0].mxu1 }
 0x10a   :  { %v673_v8 = vadd.f32 %v672_v6, %v671_v5  ;;  %v674_v9 = vpop.f32.mrb[2].mxu0  ;;  %v694_v10 = vpop.f32.mrb[1].mxu1 }
 0x10b   :  { %v675_v11 = vpop.f32.mrb[3].mxu0  ;;  %v695_v12 = vadd.f32 %v694_v10, %v693_v7  ;;  %v696_v13 = vpop.f32.mrb[2].mxu1 }
 0x10c   :  { %v697_v14 = vpop.f32.mrb[3].mxu1 }
 0x10d   :  { %v543_v15 = vadd.f32 %v695_v12, %v673_v8 }
 0x128   :  { %v715_v16 = vpop.f32.mrb[4].mxu0 }
 0x129   :  { %v716_v17 = vpop.f32.mrb[5].mxu0 }
 0x12a   :  { %v717_v18 = vadd.f32 %v716_v17, %v715_v16  ;;  %v718_v19 = vpop.f32.mrb[6].mxu0 }
 0x12b   :  { %v719_v21 = vpop.f32.mrb[7].mxu0 }
 0x12c   :  { %v583_v22 = vadd.f32 %v717_v18, %v543_v15 }
 0x12e   :  { %v588_v23 = vadd.f32 %v583_v22, %v44_v20 }
 0x130   :  { %589 = vst [vmem:[#allocation5] sm:$0x3] %v588_v23 }
 0x131   :  { %808 = shalt.err (!%p805_p12)
}
 0x132   :  { %s809_s7 = scalar_lea.hbm %s884_s3, 32 }
 0x133   :  { %p810_p13 = scmp.ne.s32.totalorder %s884_s3, %s809_s7  ;;  %p813_p0 = scmp.lt.u32.totalorder %s809_s7, %s884_s3 }
 0x135   :  { %p815_p1 = pnand %p813_p0, %p810_p13 }
 0x137   :  { %818 = shalt.err (!%p815_p1)
}
 0x138   :  { %599 = dma.vmem_to_hbm [thread:$0]  %s597_s2, 32, %s884_s3, [#allocation4]  }
 0x139   :  { %821 = dma.done.wait [#allocation4], 32  }
 0x13a   :  { %822 = vsyncadd [#allocation4], 4294967264 }
 0x13b   :  { %603 = vsyncpa [#allocation3], 1 }
 0x13c   :  { %604 = vsyncpa [#allocation4], 1 }

</bundles_post_ra>
